<compile_context>
chip_gen: v6e
topology: v6e:2x2x1
jax: 0.10.0
libtpu: 0.0.40
codegen_flags: <defaults>
</compile_context>

<pallas_src>
import functools

import jax
import jax.numpy as jnp
from jax.experimental import pallas as pl
from jax.experimental.pallas import tpu as pltpu

NUM_GROUPS = 32
EPS = 1e-6


def _pick_tile(n, cap):
    """Largest tile <= cap dividing n whose sublane dim is a multiple of 8
    (or the full extent)."""
    if n <= cap:
        return n
    for t in range(cap, 0, -1):
        if n % t == 0 and t % 8 == 0:
            return t
    return n


def _vmem_limit_bytes():
    """Explicit scoped-VMEM budget: ~3/4 of physical, capped at 100 MiB
    (v5e/v6e: ~96 MiB, v7x: ~48 MiB)."""
    try:
        cap = pltpu.get_tpu_info().vmem_capacity_bytes
    except Exception:
        cap = 64 * 1024 * 1024
    return int(min(cap * 3 // 4, 100 * 1024 * 1024))


# --------------------------------------------------------------------------
# Kernel A: GroupNorm apply + fused qkv projection (scale folded into q),
#           single lane-dense (TN, 3C) output store.
# --------------------------------------------------------------------------
def _norm_qkv_kernel(x_ref, mean_ref, rstd_ref, gamma_ref, beta_ref,
                     wqkv_ref, bqkv_ref, qkv_ref):
    x = x_ref[0].astype(jnp.float32)                                 # (TN, C)

    scale_vec = rstd_ref[0] * gamma_ref[...].astype(jnp.float32)     # (1, C)
    shift = beta_ref[...].astype(jnp.float32) - mean_ref[0] * scale_vec
    h = x * scale_vec + shift                                        # (TN, C) f32

    # One fused (TN, C) @ (C, 3C) bf16 matmul, f32 accumulation.
    qkv = jnp.dot(h.astype(jnp.bfloat16), wqkv_ref[...],
                  preferred_element_type=jnp.float32)                # (TN, 3C)
    qkv = qkv + bqkv_ref[...].astype(jnp.float32)

    # Single lane-dense store (no q/k/v lane slicing, one output DMA).
    qkv_ref[0] = qkv.astype(qkv_ref.dtype)


# --------------------------------------------------------------------------
# Kernel B: resident-KV flash attention + output projection + residual.
# --------------------------------------------------------------------------
def _flash_attn_proj_kernel(qkv_ref, x_ref, wp_ref, bp_ref, o_ref,
                            m_sc, l_sc, acc_sc, *, tk):
    tq = x_ref.shape[1]
    c = x_ref.shape[2]
    j = pl.program_id(1)
    ki = pl.program_id(2)

    @pl.when(ki == 0)
    def _():
        m_sc[...] = jnp.full(m_sc.shape, -jnp.inf, jnp.float32)
        l_sc[...] = jnp.zeros(l_sc.shape, jnp.float32)
        acc_sc[...] = jnp.zeros(acc_sc.shape, jnp.float32)

    # Slice q/k/v out of the batch-resident fused (N, 3C) block in VMEM.
    q_start = pl.multiple_of(j * tq, tq)
    k_start = pl.multiple_of(ki * tk, tk)
    q = qkv_ref[0, pl.ds(q_start, tq), pl.ds(0, c)]      # (TQ, C) bf16, pre-scaled
    k = qkv_ref[0, pl.ds(k_start, tk), pl.ds(c, c)]      # (TK, C) bf16
    v = qkv_ref[0, pl.ds(k_start, tk), pl.ds(2 * c, c)]  # (TK, C) bf16

    # scores: contract last dims directly (no explicit transpose of k).
    s = jax.lax.dot_general(q, k, (((1,), (1,)), ((), ())),
                            preferred_element_type=jnp.float32)      # (TQ, TK)

    # Online softmax.  m/l scratch is lane-wide (TQ, 128) so stores/loads are
    # full-width; exp-heavy work stays on (TQ, 1) / (TQ, TK) shapes.
    m_prev = m_sc[...]                                               # (TQ, 128)
    m_new = jnp.maximum(m_prev, jnp.max(s, axis=-1, keepdims=True))  # (TQ, 128)
    m_col = m_new[:, 0:1]                                            # (TQ, 1)
    alpha = jnp.exp(m_prev[:, 0:1] - m_col)                          # (TQ, 1)
    p = jnp.exp(s - m_col)                                           # (TQ, TK)

    l_sc[...] = alpha * l_sc[...] + jnp.sum(p, axis=-1, keepdims=True)
    acc_sc[...] = alpha * acc_sc[...] + jnp.dot(
        p.astype(jnp.bfloat16), v, preferred_element_type=jnp.float32)
    m_sc[...] = m_new

    @pl.when(ki == pl.num_programs(2) - 1)
    def _():
        # Normalize the accumulator (not the (TQ,TK) matrix); EUP reciprocal.
        inv_l = pl.reciprocal(l_sc[:, 0:1], approx=True)             # (TQ, 1)
        out = acc_sc[...] * inv_l                                    # (TQ, C) f32
        y = jnp.dot(out.astype(jnp.bfloat16), wp_ref[...],
                    preferred_element_type=jnp.float32)
        y = y + bp_ref[...].astype(jnp.float32)
        o_ref[0] = (x_ref[0].astype(jnp.float32) + y).astype(o_ref.dtype)


# --------------------------------------------------------------------------
# Wrapper
# --------------------------------------------------------------------------
def spatial_self_attention(x_nchw, params):
    """x_nchw: (B, C, H, W) float32. params: dict of weights (see init_params)."""
    b, c, h, w = x_nchw.shape
    n = h * w
    cs = c // NUM_GROUPS
    vmem_limit = _vmem_limit_bytes()

    # NCHW -> (B, N, C) tokens.
    # TODO(synk): accept channels-last activations at the op boundary to avoid
    # the two standalone HBM relayout passes (kept as XLA transposes here).
    x_tok = jnp.transpose(x_nchw, (0, 2, 3, 1)).reshape(b, n, c)

    # GroupNorm statistics in a single pass over x (sum + sum of squares),
    # computed wrapper-side so the Pallas kernels can tile over N freely.
    xg = x_tok.reshape(b, n, NUM_GROUPS, cs).astype(jnp.float32)
    cnt = jnp.float32(n * cs)
    s1 = jnp.sum(xg, axis=(1, 3))
    s2 = jnp.sum(xg * xg, axis=(1, 3))
    mean_g = s1 / cnt                                                # (B, G)
    var_g = jnp.maximum(s2 / cnt - mean_g * mean_g, 0.0)             # (B, G)
    rstd_g = jax.lax.rsqrt(var_g + EPS)
    mean_c = jnp.repeat(mean_g, cs, axis=1).reshape(b, 1, c)
    rstd_c = jnp.repeat(rstd_g, cs, axis=1).reshape(b, 1, c)

    # Fuse q/k/v weights, fold softmax scale into Wq/bq, bf16 MXU operands.
    scale = float(c) ** -0.5
    wqkv = jnp.concatenate(
        [params["wq"] * scale, params["wk"], params["wv"]], axis=1
    ).astype(jnp.bfloat16)                                           # (C, 3C)
    bqkv = jnp.concatenate(
        [params["bq"] * scale, params["bk"], params["bv"]], axis=1
    ).astype(jnp.float32)                                            # (1, 3C)
    wp = params["wp"].astype(jnp.bfloat16)                           # (C, C)
    bp = params["bp"].astype(jnp.float32)                            # (1, C)

    # ---- kernel A: norm + fused qkv (single (B, N, 3C) output) ----------
    tn = _pick_tile(n, 1024)
    qkv_tok = pl.pallas_call(
        _norm_qkv_kernel,
        out_shape=jax.ShapeDtypeStruct((b, n, 3 * c), jnp.bfloat16),
        grid_spec=pltpu.PrefetchScalarGridSpec(
            num_scalar_prefetch=0,
            grid=(b, n // tn),
            in_specs=[
                pl.BlockSpec((1, tn, c), lambda i, j: (i, j, 0)),    # x
                pl.BlockSpec((1, 1, c), lambda i, j: (i, 0, 0)),     # mean
                pl.BlockSpec((1, 1, c), lambda i, j: (i, 0, 0)),     # rstd
                pl.BlockSpec((1, c), lambda i, j: (0, 0)),           # gamma
                pl.BlockSpec((1, c), lambda i, j: (0, 0)),           # beta
                pl.BlockSpec((c, 3 * c), lambda i, j: (0, 0)),       # Wqkv
                pl.BlockSpec((1, 3 * c), lambda i, j: (0, 0)),       # bqkv
            ],
            out_specs=pl.BlockSpec((1, tn, 3 * c), lambda i, j: (i, j, 0)),
        ),
        compiler_params=pltpu.CompilerParams(
            dimension_semantics=("parallel", "parallel"),
            vmem_limit_bytes=vmem_limit),
    )(x_tok, mean_c, rstd_c, params["gamma"], params["beta"], wqkv, bqkv)

    # ---- kernel B: resident-KV flash attention + proj + residual --------
    tq = _pick_tile(n, 512)
    tk = _pick_tile(n, 512)
    out_tok = pl.pallas_call(
        functools.partial(_flash_attn_proj_kernel, tk=tk),
        out_shape=jax.ShapeDtypeStruct((b, n, c), x_tok.dtype),
        grid_spec=pltpu.PrefetchScalarGridSpec(
            num_scalar_prefetch=0,
            grid=(b, n // tq, n // tk),
            in_specs=[
                # Fused qkv: full-N block, constant index over (j, kk) ->
                # fetched from HBM once per batch, VMEM-resident thereafter.
                pl.BlockSpec((1, n, 3 * c), lambda i, j, kk: (i, 0, 0)),
                pl.BlockSpec((1, tq, c), lambda i, j, kk: (i, j, 0)),   # x residual
                pl.BlockSpec((c, c), lambda i, j, kk: (0, 0)),          # Wp
                pl.BlockSpec((1, c), lambda i, j, kk: (0, 0)),          # bp
            ],
            out_specs=pl.BlockSpec((1, tq, c), lambda i, j, kk: (i, j, 0)),
            scratch_shapes=[
                pltpu.VMEM((tq, 128), jnp.float32),   # running max m (lane-wide)
                pltpu.VMEM((tq, 128), jnp.float32),   # running sum l (lane-wide)
                pltpu.VMEM((tq, c), jnp.float32),     # output accumulator
            ],
        ),
        compiler_params=pltpu.CompilerParams(
            dimension_semantics=("parallel", "parallel", "arbitrary"),
            vmem_limit_bytes=vmem_limit),
    )(qkv_tok, x_tok, wp, bp)

    # (B, N, C) -> NCHW
    return jnp.transpose(out_tok.reshape(b, h, w, c), (0, 3, 1, 2))


def init_params(key, c):
    """Deterministic synthetic parameters. Conv2d(k=1) weights (C_out, C_in, 1, 1)
    are stored pre-transposed as (C_in, C_out) for the channel matmul."""
    ks = jax.random.split(key, 8)
    scale = 1.0 / jnp.sqrt(jnp.float32(c))
    def wmat(k):
        return jax.random.uniform(k, (c, c), jnp.float32, -1.0, 1.0) * scale
    def bvec(k):
        return jax.random.uniform(k, (1, c), jnp.float32, -1.0, 1.0) * scale
    return {
        "gamma": jnp.ones((1, c), jnp.float32),       # GroupNorm affine init
        "beta": jnp.zeros((1, c), jnp.float32),
        "wq": wmat(ks[0]), "bq": bvec(ks[1]),
        "wk": wmat(ks[2]), "bk": bvec(ks[3]),
        "wv": wmat(ks[4]), "bv": bvec(ks[5]),
        "wp": wmat(ks[6]), "bp": bvec(ks[7]),
    }


def _reference(x_nchw, params):
    """Pure-JAX f32 reference mirroring the PyTorch forward."""
    b, c, h, w = x_nchw.shape
    cs = c // NUM_GROUPS
    xg = x_nchw.reshape(b, NUM_GROUPS, cs, h, w)
    mean = xg.mean(axis=(2, 3, 4), keepdims=True)
    var = xg.var(axis=(2, 3, 4), keepdims=True)
    hn = ((xg - mean) / jnp.sqrt(var + EPS)).reshape(b, c, h, w)
    hn = hn * params["gamma"].reshape(1, c, 1, 1) + params["beta"].reshape(1, c, 1, 1)
    ht = jnp.transpose(hn, (0, 2, 3, 1)).reshape(b, h * w, c)        # (B,N,C)
    q = ht @ params["wq"] + params["bq"]
    k = ht @ params["wk"] + params["bk"]
    v = ht @ params["wv"] + params["bv"]
    s = jnp.einsum("bic,bjc->bij", q, k) * (int(c) ** -0.5)
    a = jax.nn.softmax(s, axis=2)
    o = jnp.einsum("bij,bjc->bic", a, v)
    y = o @ params["wp"] + params["bp"]
    y = jnp.transpose(y.reshape(b, h, w, c), (0, 3, 1, 2))
    return x_nchw + y


if __name__ == "__main__":
    key = jax.random.PRNGKey(0)
    kx, kp = jax.random.split(key)

    B, C, H, W = 2, 32, 8, 8   # C must be divisible by 32 (GroupNorm groups)
    x = jax.random.normal(kx, (B, C, H, W), jnp.float32)
    params = init_params(kp, C)

    out = spatial_self_attention(x, params)
    out = jax.block_until_ready(out)

    ref = _reference(x, params)
    assert out.shape == (B, C, H, W)
    # bf16 MXU operands + approx reciprocal => slightly looser tolerance than f32.
    assert jnp.allclose(out, ref, atol=2e-2, rtol=2e-2), float(
        jnp.max(jnp.abs(out - ref)))

    print("KERNEL_OK")
</pallas_src>

<mosaic_0001>
module attributes {stable_mosaic.version = 11 : i64} {
  func.func @_norm_qkv_kernel(%arg0: i32, %arg1: i32, %arg2: memref<1x64x32xf32, #tpu.memory_space<vmem>>, %arg3: memref<1x1x32xf32, #tpu.memory_space<vmem>>, %arg4: memref<1x1x32xf32, #tpu.memory_space<vmem>>, %arg5: memref<1x32xf32, #tpu.memory_space<vmem>>, %arg6: memref<1x32xf32, #tpu.memory_space<vmem>>, %arg7: memref<32x96xbf16, #tpu.memory_space<vmem>>, %arg8: memref<1x96xf32, #tpu.memory_space<vmem>>, %arg9: memref<1x64x96xbf16, #tpu.memory_space<vmem>>) attributes {dimension_semantics = [#tpu.dimension_semantics<parallel>, #tpu.dimension_semantics<parallel>], iteration_bounds = array<i64: 2, 1>, scalar_prefetch = 0 : i64, scratch_operands = 0 : i64, tpu.core_type = #tpu.core_type<tc>, window_params = [{transform_indices = @transform_0, window_bounds = array<i64: 1, 64, 32>}, {transform_indices = @transform_1, window_bounds = array<i64: 1, 1, 32>}, {transform_indices = @transform_2, window_bounds = array<i64: 1, 1, 32>}, {pipeline_mode = #tpu.pipeline_mode<synchronous>, transform_indices = @transform_3, window_bounds = array<i64: 1, 32>}, {pipeline_mode = #tpu.pipeline_mode<synchronous>, transform_indices = @transform_4, window_bounds = array<i64: 1, 32>}, {pipeline_mode = #tpu.pipeline_mode<synchronous>, transform_indices = @transform_5, window_bounds = array<i64: 32, 96>}, {pipeline_mode = #tpu.pipeline_mode<synchronous>, transform_indices = @transform_6, window_bounds = array<i64: 1, 96>}, {transform_indices = @transform_7, window_bounds = array<i64: 1, 64, 96>}]} {
    %c0 = arith.constant 0 : index
    %c0_0 = arith.constant 0 : index
    %c0_1 = arith.constant 0 : index
    %0 = vector.load %arg2[%c0, %c0_0, %c0_1] : memref<1x64x32xf32, #tpu.memory_space<vmem>>, vector<1x64x32xf32>
    %1 = vector.shape_cast %0 : vector<1x64x32xf32> to vector<64x32xf32>
    %c0_2 = arith.constant 0 : index
    %c0_3 = arith.constant 0 : index
    %c0_4 = arith.constant 0 : index
    %2 = vector.load %arg4[%c0_2, %c0_3, %c0_4] : memref<1x1x32xf32, #tpu.memory_space<vmem>>, vector<1x1x32xf32>
    %3 = vector.shape_cast %2 : vector<1x1x32xf32> to vector<1x32xf32>
    %c0_5 = arith.constant 0 : index
    %c0_6 = arith.constant 0 : index
    %4 = vector.load %arg5[%c0_5, %c0_6] : memref<1x32xf32, #tpu.memory_space<vmem>>, vector<1x32xf32>
    %5 = arith.mulf %3, %4 : vector<1x32xf32>
    %c0_7 = arith.constant 0 : index
    %c0_8 = arith.constant 0 : index
    %6 = vector.load %arg6[%c0_7, %c0_8] : memref<1x32xf32, #tpu.memory_space<vmem>>, vector<1x32xf32>
    %c0_9 = arith.constant 0 : index
    %c0_10 = arith.constant 0 : index
    %c0_11 = arith.constant 0 : index
    %7 = vector.load %arg3[%c0_9, %c0_10, %c0_11] : memref<1x1x32xf32, #tpu.memory_space<vmem>>, vector<1x1x32xf32>
    %8 = vector.shape_cast %7 : vector<1x1x32xf32> to vector<1x32xf32>
    %9 = arith.mulf %8, %5 : vector<1x32xf32>
    %10 = arith.subf %6, %9 : vector<1x32xf32>
    %11 = vector.broadcast %5 : vector<1x32xf32> to vector<64x32xf32>
    %12 = arith.mulf %1, %11 : vector<64x32xf32>
    %13 = vector.broadcast %10 : vector<1x32xf32> to vector<64x32xf32>
    %14 = arith.addf %12, %13 : vector<64x32xf32>
    %15 = arith.truncf %14 : vector<64x32xf32> to vector<64x32xbf16>
    %c0_12 = arith.constant 0 : index
    %c0_13 = arith.constant 0 : index
    %16 = vector.load %arg7[%c0_12, %c0_13] : memref<32x96xbf16, #tpu.memory_space<vmem>>, vector<32x96xbf16>
    %cst = arith.constant dense<0.000000e+00> : vector<64x96xf32>
    %17 = tpu.matmul %15, %16, %cst {dimension_numbers = #tpu.dot_dimension_numbers<[1], [0], [0], [1], [0, 0, 1, 1], [], []>} : vector<64x32xbf16>, vector<32x96xbf16>, vector<64x96xf32> -> vector<64x96xf32>
    %c0_14 = arith.constant 0 : index
    %c0_15 = arith.constant 0 : index
    %18 = vector.load %arg8[%c0_14, %c0_15] : memref<1x96xf32, #tpu.memory_space<vmem>>, vector<1x96xf32>
    %19 = vector.broadcast %18 : vector<1x96xf32> to vector<64x96xf32>
    %20 = arith.addf %17, %19 : vector<64x96xf32>
    %21 = arith.truncf %20 : vector<64x96xf32> to vector<64x96xbf16>
    %c0_16 = arith.constant 0 : index
    %c0_17 = arith.constant 0 : index
    %c0_18 = arith.constant 0 : index
    %22 = vector.load %arg9[%c0_16, %c0_17, %c0_18] : memref<1x64x96xbf16, #tpu.memory_space<vmem>>, vector<1x64x96xbf16>
    %23 = vector.shape_cast %22 : vector<1x64x96xbf16> to vector<64x96xbf16>
    %24 = vector.shape_cast %21 : vector<64x96xbf16> to vector<1x64x96xbf16>
    tpu.vector_store %arg9[%c0_16, %c0_17, %c0_18], %24 {strides = array<i32>} : memref<1x64x96xbf16, #tpu.memory_space<vmem>>, vector<1x64x96xbf16>,
    return
  }
  func.func @transform_0(%arg0: i32, %arg1: i32) -> (i32, i32, i32) {
    %c0_i32 = arith.constant 0 : i32
    %c0_i32_0 = arith.constant 0 : i32
    return %arg0, %arg1, %c0_i32 : i32, i32, i32
  }
  func.func @transform_1(%arg0: i32, %arg1: i32) -> (i32, i32, i32) {
    %c0_i32 = arith.constant 0 : i32
    %c0_i32_0 = arith.constant 0 : i32
    %c0_i32_1 = arith.constant 0 : i32
    return %arg0, %c0_i32, %c0_i32_0 : i32, i32, i32
  }
  func.func @transform_2(%arg0: i32, %arg1: i32) -> (i32, i32, i32) {
    %c0_i32 = arith.constant 0 : i32
    %c0_i32_0 = arith.constant 0 : i32
    %c0_i32_1 = arith.constant 0 : i32
    return %arg0, %c0_i32, %c0_i32_0 : i32, i32, i32
  }
  func.func @transform_3(%arg0: i32, %arg1: i32) -> (i32, i32) {
    %c0_i32 = arith.constant 0 : i32
    %c0_i32_0 = arith.constant 0 : i32
    %c0_i32_1 = arith.constant 0 : i32
    return %c0_i32, %c0_i32_0 : i32, i32
  }
  func.func @transform_4(%arg0: i32, %arg1: i32) -> (i32, i32) {
    %c0_i32 = arith.constant 0 : i32
    %c0_i32_0 = arith.constant 0 : i32
    %c0_i32_1 = arith.constant 0 : i32
    return %c0_i32, %c0_i32_0 : i32, i32
  }
  func.func @transform_5(%arg0: i32, %arg1: i32) -> (i32, i32) {
    %c0_i32 = arith.constant 0 : i32
    %c0_i32_0 = arith.constant 0 : i32
    %c0_i32_1 = arith.constant 0 : i32
    return %c0_i32, %c0_i32_0 : i32, i32
  }
  func.func @transform_6(%arg0: i32, %arg1: i32) -> (i32, i32) {
    %c0_i32 = arith.constant 0 : i32
    %c0_i32_0 = arith.constant 0 : i32
    %c0_i32_1 = arith.constant 0 : i32
    return %c0_i32, %c0_i32_0 : i32, i32
  }
  func.func @transform_7(%arg0: i32, %arg1: i32) -> (i32, i32, i32) {
    %c0_i32 = arith.constant 0 : i32
    %c0_i32_0 = arith.constant 0 : i32
    return %arg0, %arg1, %c0_i32 : i32, i32, i32
  }
}

</mosaic_0001>

<bundles_post_ra>
// kernel: tpu_custom_call.1
= control target key start
LH: loop header
LB: loop body
LE: loop exit
PB: predicated region body
PF: predicated region fallthrough
CT: control target
= control target key end

     0   :  { %12 = vsyncpa [#allocation3], 0  ;;  %s1030_s0 = inlined_call_operand.vmem [shape: f32[2,64,32], index: 0, kind: input, shape index: {}]   ;;  %s1031_s1 = inlined_call_operand.vmem [shape: f32[2,1,32], index: 1, kind: input, shape index: {}]   ;;  %s1032_s2 = inlined_call_operand.vmem [shape: f32[2,1,32], index: 2, kind: input, shape index: {}]   ;;  %s1033_s3 = inlined_call_operand.vmem [shape: f32[1,32], index: 3, kind: input, shape index: {}]   ;;  %s1034_s4 = inlined_call_operand.vmem [shape: f32[1,32], index: 4, kind: input, shape index: {}]   ;;  %s1035_s5 = inlined_call_operand.vmem [shape: bf16[32,96], index: 5, kind: input, shape index: {}]   ;;  %s1036_s6 = inlined_call_operand.vmem [shape: f32[1,96], index: 6, kind: input, shape index: {}]   ;;  %s1037_s7 = inlined_call_operand.hbm [shape: bf16[2,64,96], index: 7, kind: output, shape index: {}]  }
   0x1   :  { %14 = vsyncpa [#allocation3 + $0x1], 0  ;;  %s879_s24 = smov 0   ;;  %s881_s25 = smov 0  }
   0x2   :  { %s883_s26 = smov 0   ;;  %s885_s27 = smov 0  }
   0x3   :  { %s887_s28 = smov 0   ;;  %s889_s29 = smov 0  }
   0x4 LB: > { %s639_s30 = sadd.s32 4294967295, %s834_s29   ;;  %s640_s8 = sadd.s32 4294967294, %s834_s29   ;;  %s834_s29 = sphi %s889_s29, %s20_s29   ;;  %s830_s28 = sphi %s887_s28, %s1044_s28   ;;  %s826_s27 = sphi %s885_s27, %s1043_s27   ;;  %s822_s26 = sphi %s883_s26, %s1042_s26   ;;  %s818_s25 = sphi %s881_s25, %s1041_s25   ;;  %s814_s24 = sphi %s879_s24, %s1040_s24  }
   0x5   : > { %s32_s9 = sadd.s32 1, %s830_s28  ;;  %s205_s10 = sadd.s32 1, %s822_s26 }
   0x6   : > { %p34_p0 = scmp.ge.s32.totalorder %s32_s9, 2  ;;  %p215_p1 = scmp.ne.s32.totalorder %s822_s26, %s818_s25 }
   0x7   : > { %p216_p2 = scmp.eq.s32.totalorder %s639_s30, 1  ;;  %p221_p3 = scmp.ne.s32.totalorder %s818_s25, %s814_s24 }
   0x8   : > { %s1046_s9 = smov (%p34_p0, %s32_s9), 0  ;;  %p222_p5 = scmp.eq.s32.totalorder %s640_s8, 1 }
   0x9   : > { %p919_p4 = por %p216_p2, %p215_p1  ;;  %s200_s12 = ssub.s32 %s830_s28, %s1046_s9 }
   0xa   : > { %p643_p6 = scmp.ge.s32.totalorder %s834_s29, 1  ;;  %p203_p7 = scmp.eq.s32.totalorder %s200_s12, 0 }
   0xb   : > { %p926_p8 = por %p222_p5, %p221_p3  ;;  %p277_p9 = scmp.lt.s32.totalorder %s834_s29, 3 }
   0xc   : > { %s932_s14 = scalar_select %p203_p7, %s822_s26, %s205_s10  }
   0xd   : > { %p278_p10 = pnand %p643_p6, %p277_p9 }
   0xe   : > { %p320_p11 = scmp.lt.s32.totalorder (!%p278_p10), %s826_s27, 1  ;;  %s676_s10 = sshll.u32 (!%p278_p10), %s826_s27, 9 }
   0xf   : > { %281 = sbr.rel (%p278_p10) target bundleno = 255 (0xff), region = 48  ;;  %s975_s17 = scalar_lea.hbm (!%p278_p10), %s1037_s7, %s676_s10 }
  0x10   : > { %s836_s21 = smov (!%p278_p10), [#allocation2]  }
  0x11   : > { %s762_s22 = sshll.u32 (!%p278_p10), %s836_s21, 4  ;;  %s763_s22 = int_to_ptr.vmem [resolvable:$false] %s762_s22 }
  0x14   : > { %v756_v0 = vld [vmem:[%s1035_s5 + $0x8] sm:$0xff]   ;;  %v353_v1 = vlaneseq  ;;  %v757_v2 = vld [vmem:[%s1035_s5] sm:$0xff]   ;;  %s321_s19 = scalar_select %p320_p11, %s826_s27, 1  ;;  %vm407_vm0 = vcmask 261120   ;;  %vm517_vm1 = vcmask 781312  }
  0x15   : > { %683 = vmatprep.subr.bf16.mxu0 %v756_v0  ;;  %695 = vmatprep.subr.bf16.mxu1 %v756_v0  ;;  %v346_v4 = vld [vmem:[%s1033_s3] sm:$0x1] }
  0x16   : > { %v354_v3 = vshrl.u32 %v353_v1, 7  ;;  %684 = vmatpush3.bf16.msra.mxu0 %v756_v0  ;;  %697 = vmatpush3.bf16.msra.mxu1 %v756_v0  ;;  %s667_s20 = sshll.u32 %s321_s19, 6  ;;  %s331_s23 = scalar_lea.vmem %s1031_s1, %s321_s19  ;;  %v348_v10 = vld [vmem:[%s1034_s4] sm:$0x1] }
  0x17   : > { %685 = vmatprep.subr.bf16.mxu0 %v757_v2  ;;  %696 = vmatprep.subr.bf16.mxu1 %v757_v2  ;;  %s327_s15 = scalar_lea.vmem %s1030_s0, %s667_s20  ;;  %s334_s18 = scalar_lea.vmem %s1032_s2, %s321_s19  ;;  %v349_v7 = vld [vmem:[%s331_s23] sm:$0x1] }
  0x18   : > { %v355_v5 = vsub.s32 0, %v354_v3  ;;  %v345_v6 = vld [vmem:[%s334_s18] sm:$0x1]  ;;  %v338_v11 = vld [vmem:[%s327_s15 + $0x8] sm:$0xff]  ;;  %v339_v16 = vld [vmem:[%s327_s15 + $0x10] sm:$0xff]  ;;  %s316_s19 = sand.u32 1, %s818_s25  }
  0x19   : > { %v337_v8 = vld [vmem:[%s327_s15] sm:$0xff]  ;;  %v347_v9 = vmul.f32 %v346_v4, %v345_v6  ;;  %v342_v13 = vld [vmem:[%s327_s15 + $0x28] sm:$0xff]  ;;  %v340_v17 = vld [vmem:[%s327_s15 + $0x18] sm:$0xff]  ;;  %s644_s30 = sshll.u32 %s316_s19, 5  ;;  %s985_s27 = scalar_lea.sflag [#allocation3], %s316_s19 }
  0x1a   : > { %686 = vmatpush3.bf16.msra.mxu0 %v757_v2  ;;  %698 = vmatpush3.bf16.msra.mxu1 %v757_v2  ;;  %v341_v12 = vld [vmem:[%s327_s15 + $0x20] sm:$0xff]  ;;  %v343_v18 = vld [vmem:[%s327_s15 + $0x30] sm:$0xff]  ;;  %v344_v19 = vld [vmem:[%s327_s15 + $0x38] sm:$0xff]  ;;  %s318_s8 = scalar_lea.vmem [#allocation2], %s644_s30  ;;  %s764_s20 = scalar_lea.vmem %s763_s22, 1024 }
  0x1b   : > { %v350_v14 = vmul.f32 %v349_v7, %v347_v9  ;;  %v356_v15 = vrot.slane %v347_v9, %v355_v5  ;;  %v647_v42 = vld [vmem:[%s1036_s6] ss:$0 sm:$0xff]  ;;  %s542_s12 = sshll.u32 %s318_s8, 4  ;;  %s977_s12 = int_to_ptr.vmem [resolvable:$true] %s542_s12 }
  0x1c   : > { %s758_s18 = scalar_lea.vmem %s977_s12, 512  ;;  %p765_p1 = scmp.lt.s32.totalorder %s977_s12, %s763_s22 }
  0x1d   : > { %v351_v20 = vsub.f32 %v348_v10, %v350_v14  ;;  %v358_v21 = vmul.f32 %v356_v15, %v337_v8  ;;  %v359_v22 = vmul.f32 %v356_v15, %v338_v11  ;;  %v362_v23 = vmul.f32 %v356_v15, %v341_v12  ;;  %p759_p12 = scmp.ne.s32.totalorder %s977_s12, %s758_s18  ;;  %p766_p2 = scmp.lt.s32.totalorder %s764_s20, %s758_s18 }
  0x1e   : > { %v363_v24 = vmul.f32 %v356_v15, %v342_v13  ;;  %v360_v25 = vmul.f32 %v356_v15, %v339_v16  ;;  %v361_v26 = vmul.f32 %v356_v15, %v340_v17  ;;  %v364_v27 = vmul.f32 %v356_v15, %v343_v18 }
  0x1f   : > { %v370_v28 = vrot.slane %v351_v20, %v355_v5  ;;  %v365_v29 = vmul.f32 %v356_v15, %v344_v19  ;;  %p760_p13 = pnand %p759_p12, %p919_p4  ;;  %p767_p3 = por %p766_p2, %p765_p1 }
  0x21   : > { %v372_v30 = vadd.f32 %v370_v28, %v358_v21  ;;  %v373_v31 = vadd.f32 %v370_v28, %v359_v22  ;;  %v376_v32 = vadd.f32 %v370_v28, %v362_v23  ;;  %v377_v33 = vadd.f32 %v370_v28, %v363_v24  ;;  %p761_p0 = pneg %p760_p13 }
  0x22   : > { %v374_v34 = vadd.f32 %v370_v28, %v360_v25  ;;  %v375_v35 = vadd.f32 %v370_v28, %v361_v26  ;;  %v378_v36 = vadd.f32 %v370_v28, %v364_v27  ;;  %v379_v37 = vadd.f32 %v370_v28, %v365_v29 }
  0x23   : > { %v380_v38 = vpack.c.bf16 %v373_v31, %v372_v30  ;;  %v382_v39 = vpack.c.bf16 %v377_v33, %v376_v32  ;;  %p768_p5 = pnand %p767_p3, %p761_p0 }
  0x24   : > { %v381_v40 = vpack.c.bf16 %v375_v35, %v374_v34  ;;  %v383_v41 = vpack.c.bf16 %v379_v37, %v378_v36 }
  0x25   : > { %687 = vmatprep.mubr.msk.bf16.mxu0 %vm407_vm0, %v380_v38  ;;  %691 = vmatprep.mubr.msk.bf16.mxu1 %vm407_vm0, %v382_v39 }
  0x26   : > { %688 = vmatmul.mubr.msk.bf16.vlgmr.msra.gmra.mxu0 %vm407_vm0, %v381_v40  ;;  %692 = vmatmul.mubr.msk.bf16.vlgmr.msra.gmra.mxu1 %vm407_vm0, %v383_v41 }
  0xe6   : > { %v689_v43 = vpop.f32.mrf.mxu0  ;;  %v693_v44 = vpop.f32.mrf.mxu1 }
  0xe7   : > { %v463_v45 = vadd.f32 %v689_v43, %v647_v42  ;;  %v479_v46 = vadd.f32 %v693_v44, %v647_v42 }
  0xe8   : > { %v454_v47 = vpop.f32.mrf.mxu0  ;;  %v470_v48 = vpop.f32.mrf.mxu1 }
  0xe9   : > { %v670_v49 = vpack.c.bf16 %v463_v45, %v463_v45  ;;  %v674_v50 = vpack.c.bf16 %v479_v46, %v479_v46  ;;  %v455_v51 = vadd.f32 %v647_v42, %v454_v47  ;;  %v471_v52 = vadd.f32 %v647_v42, %v470_v48 }
  0xea   : > { %v690_v53 = vpop.f32.mrf.mxu0  ;;  %v694_v54 = vpop.f32.mrf.mxu1 }
  0xeb   : > { %520 = vst.msk [vmem:[%s318_s8 + $0x8] sm:$0xf] %vm517_vm1, %v670_v49  ;;  %524 = vst.msk [vmem:[%s318_s8 + $0x18] sm:$0xf] %vm517_vm1, %v674_v50  ;;  %v668_v55 = vpack.c.bf16 %v455_v51, %v455_v51  ;;  %v672_v56 = vpack.c.bf16 %v471_v52, %v471_v52  ;;  %v466_v57 = vadd.f32 %v690_v53, %v647_v42 }
  0xec   : > { %v482_v58 = vadd.f32 %v694_v54, %v647_v42  ;;  %v457_v59 = vpop.f32.mrf.mxu0  ;;  %v473_v60 = vpop.f32.mrf.mxu1 }
  0xed   : > { %518 = vst.msk [vmem:[%s318_s8] sm:$0xf] %vm517_vm1, %v668_v55  ;;  %522 = vst.msk [vmem:[%s318_s8 + $0x10] sm:$0xf] %vm517_vm1, %v672_v56  ;;  %v671_v61 = vpack.c.bf16 %v466_v57, %v466_v57  ;;  %v458_v63 = vadd.f32 %v647_v42, %v457_v59  ;;  %v474_v0 = vadd.f32 %v647_v42, %v473_v60 }
  0xee   : > { %v675_v62 = vpack.c.bf16 %v482_v58, %v482_v58 }
  0xef   : > { %521 = vst.msk [vmem:[%s318_s8 + $0xc] sm:$0xf] %vm517_vm1, %v671_v61  ;;  %v669_v1 = vpack.c.bf16 %v458_v63, %v458_v63  ;;  %v673_v2 = vpack.c.bf16 %v474_v0, %v474_v0 }
  0xf0   : > { %525 = vst.msk [vmem:[%s318_s8 + $0x1c] sm:$0xf] %vm517_vm1, %v675_v62 }
  0xf1   : > { %519 = vst.msk [vmem:[%s318_s8 + $0x4] sm:$0xf] %vm517_vm1, %v669_v1  ;;  %523 = vst.msk [vmem:[%s318_s8 + $0x14] sm:$0xf] %vm517_vm1, %v673_v2 }
  0xf2   : > { %771 = shalt.err (!%p768_p5)
}
  0xf3   : > { %s772_s19 = scalar_lea.hbm %s975_s17, 512  ;;  %s776_s8 = scalar_lea.hbm %s1037_s7, 1024 }
  0xf4   : > { %p773_p6 = scmp.ne.s32.totalorder %s975_s17, %s772_s19  ;;  %p777_p10 = scmp.lt.s32.totalorder %s975_s17, %s1037_s7 }
  0xf5   : > { %p778_p11 = scmp.lt.s32.totalorder %s776_s8, %s772_s19 }
  0xf6   : > { %p774_p7 = pnand %p773_p6, %p919_p4 }
  0xf7   : > { %p779_p12 = por %p778_p11, %p777_p10 }
  0xf8   : > { %p775_p9 = pneg %p774_p7 }
  0xfa   : > { %p780_p13 = pnand %p779_p12, %p775_p9 }
  0xfc   : > { %783 = shalt.err (!%p780_p13)
}
  0xfd   : > { %s837_s16 = smov 64   ;;  %s838_s18 = smov 4  }
  0xfe   : > { %699 = dma.vmem_to_hbm [thread:$0]  (%p919_p4), %s977_s12, 512, %s975_s17, %s985_s27, %s837_s16, %s837_s16, %s838_s18  }
  0xff PF: > { %p705_p0 = scmp.ge.s32.totalorder %s834_s29, 2  ;;  %s557_s21 = sand.u32 1, %s814_s24  }
 0x100   : > { %s558_s22 = scalar_lea.sflag [#allocation3], %s557_s21 }
 0x101   : > { %p702_p1 = pnand %p705_p0, %p926_p8 }
 0x103   : > { %p703_p2 = pneg %p702_p1 }
 0x105   : > { %809 = dma.done.wait (%p703_p2), %s558_s22, 512  }
 0x106   : > { %811 = vsyncadd (%p703_p2), %s558_s22, 4294966784  ;;  %s20_s29 = sadd.s32 1, %s834_s29   ;;  %s1040_s24 = smov %s818_s25 }
 0x107   : > { %p17_p3 = scmp.ge.s32.totalorder %s20_s29, 4   ;;  %s1041_s25 = smov %s822_s26 }
 0x108   : > { %s1042_s26 = smov %s932_s14  ;;  %s1043_s27 = smov %s830_s28 }
 0x109   : > { %s1044_s28 = smov %s1046_s9  ;;  %19 = sbr.rel (!%p17_p3) target bundleno = 4 (0x4), region = 89 }
 0x10e   :  { %563 = vsyncpa [#allocation3], 1 }
 0x10f   :  { %565 = vsyncpa [#allocation3 + $0x1], 1 }

</bundles_post_ra>
